<compile_context>
chip_gen: v7x
topology: tpu7x:2x2x1
jax: 0.10.0
libtpu: 0.0.40
codegen_flags: <defaults>
</compile_context>

<pallas_src>
import functools

import jax
import jax.numpy as jnp
from jax.experimental import pallas as pl
from jax.experimental.pallas import tpu as pltpu


def _round_up(n, m):
    return (n + m - 1) // m * m


def _cdiv(a, b):
    return (a + b - 1) // b


def simple_nn_kernel(x_ref, w1_ref, b1_ref, w2_ref, b2_ref, w3_ref, b3_ref,
                     out_ref):
    x = x_ref[...]                                           # (TM, D_in) f32

    # Layer 1: Linear(input_dim, 128) + ReLU
    h1 = jnp.dot(x, w1_ref[...], preferred_element_type=jnp.float32)
    h1 = jnp.maximum(h1 + b1_ref[...], 0.0)

    # Dropout(0.2): identity at inference time.
    # TODO(synk): training-mode dropout (pltpu.prng_seed/prng_random_bits mask,
    #             seeded per batch tile) not emitted.

    # Layer 2: Linear(128, 64) + ReLU
    h2 = jnp.dot(h1, w2_ref[...], preferred_element_type=jnp.float32)
    h2 = jnp.maximum(h2 + b2_ref[...], 0.0)

    # Layer 3: Linear(64, num_classes) — logits, no activation.
    out = jnp.dot(h2, w3_ref[...], preferred_element_type=jnp.float32)
    out_ref[...] = (out + b3_ref[...]).astype(out_ref.dtype)


def _select_tm(batch, tm_target):
    """Padding-aware tile selection; >=2 grid steps when the batch can split."""
    n_tiles = max(_cdiv(batch, tm_target), 1)
    if batch >= 16 and n_tiles < 2:
        n_tiles = 2                       # let v7x's two TensorCores both work
    return _round_up(_cdiv(batch, n_tiles), 8)


@functools.partial(jax.jit, static_argnames=("tm",))
def simple_nn_forward(x, params, *, tm=4096):
    """x: (batch, input_dim) f32. params: f32 (in,out) weights + (1,out) biases."""
    w1, b1, w2, b2, w3, b3 = params
    batch, d_in = x.shape
    hidden1 = w1.shape[1]          # 128
    hidden2 = w2.shape[1]          # 64
    num_classes = w3.shape[1]

    # ---- batch tiling: TM multiple of 8 (f32 sublanes), minimal padding ----
    tm = _select_tm(batch, tm)
    b_pad = _round_up(batch, tm)
    x_p = x
    if b_pad != batch:
        x_p = jnp.pad(x_p, ((0, b_pad - batch), (0, 0)))

    grid = (b_pad // tm,)
    const = lambda a: pl.BlockSpec(a.shape, lambda i: (0,) * a.ndim)

    # ---- scheduling hints ----
    flops = 2 * b_pad * (d_in * hidden1 + hidden1 * hidden2
                         + hidden2 * num_classes)
    bytes_accessed = 4 * (
        b_pad * d_in + b_pad * num_classes
        + w1.size + b1.size + w2.size + b2.size + w3.size + b3.size)

    weights_bytes = 4 * (w1.size + b1.size + w2.size + b2.size
                         + w3.size + b3.size)
    io_bytes = 2 * 4 * tm * (d_in + num_classes)       # double-buffered x/out
    scratch_bytes = 4 * tm * (hidden1 + hidden2)       # h1/h2 intermediates
    vmem_limit = min(
        48 * 1024 * 1024,
        max(32 * 1024 * 1024,
            2 * (weights_bytes + io_bytes + scratch_bytes) + (1 << 20)))

    out = pl.pallas_call(
        simple_nn_kernel,
        out_shape=jax.ShapeDtypeStruct((b_pad, num_classes), jnp.float32),
        grid=grid,
        in_specs=[
            pl.BlockSpec((tm, d_in), lambda i: (i, 0)),      # x: tiled
            const(w1), const(b1),                            # weights/biases:
            const(w2), const(b2),                            #   VMEM-resident
            const(w3), const(b3),
        ],
        out_specs=pl.BlockSpec((tm, num_classes), lambda i: (i, 0)),
        compiler_params=pltpu.CompilerParams(
            dimension_semantics=("parallel",),
            vmem_limit_bytes=int(vmem_limit)),
        cost_estimate=pl.CostEstimate(
            flops=flops, transcendentals=0, bytes_accessed=bytes_accessed),
    )(x_p, w1, b1, w2, b2, w3, b3)

    return out[:batch]


def init_params(key, input_dim, num_classes):
    """Deterministic synthetic parameters matching the nn.Module shapes."""
    ks = jax.random.split(key, 6)
    # Weights stored as (in_features, out_features) for x @ W.
    w1 = jax.random.normal(ks[0], (input_dim, 128), jnp.float32) * 0.1
    b1 = jax.random.normal(ks[1], (1, 128), jnp.float32) * 0.01
    w2 = jax.random.normal(ks[2], (128, 64), jnp.float32) * 0.1
    b2 = jax.random.normal(ks[3], (1, 64), jnp.float32) * 0.01
    w3 = jax.random.normal(ks[4], (64, num_classes), jnp.float32) * 0.1
    b3 = jax.random.normal(ks[5], (1, num_classes), jnp.float32) * 0.01
    return (w1, b1, w2, b2, w3, b3)


def _reference(x, params):
    """Plain-JAX f32 reference (matches PyTorch eval() forward)."""
    w1, b1, w2, b2, w3, b3 = params
    h1 = jnp.maximum(x @ w1 + b1, 0.0)
    h2 = jnp.maximum(h1 @ w2 + b2, 0.0)
    return h2 @ w3 + b3


if __name__ == "__main__":
    key = jax.random.PRNGKey(0)

    # input_dim = num one-hot data_type columns (e.g. 5) + 3 scaled xyz cols = 8
    batch, input_dim, num_classes = 8, 8, 4

    k_x, k_p = jax.random.split(key)
    x = jax.random.normal(k_x, (batch, input_dim), jnp.float32)
    params = init_params(k_p, input_dim, num_classes)

    logits = simple_nn_forward(x, params)
    jax.block_until_ready(logits)

    ref = _reference(x, params)
    assert logits.shape == (batch, num_classes)
    assert jnp.allclose(logits, ref, atol=1e-3, rtol=1e-3), (
        float(jnp.max(jnp.abs(logits - ref))))

    print("KERNEL_OK")
</pallas_src>

<mosaic_0001>
module attributes {stable_mosaic.version = 11 : i64} {
  func.func @simple_nn_kernel(%arg0: i32, %arg1: memref<8x8xf32, #tpu.memory_space<vmem>>, %arg2: memref<8x128xf32, #tpu.memory_space<vmem>>, %arg3: memref<1x128xf32, #tpu.memory_space<vmem>>, %arg4: memref<128x64xf32, #tpu.memory_space<vmem>>, %arg5: memref<1x64xf32, #tpu.memory_space<vmem>>, %arg6: memref<64x4xf32, #tpu.memory_space<vmem>>, %arg7: memref<1x4xf32, #tpu.memory_space<vmem>>, %arg8: memref<8x4xf32, #tpu.memory_space<vmem>>) attributes {dimension_semantics = [#tpu.dimension_semantics<parallel>], iteration_bounds = array<i64: 1>, scalar_prefetch = 0 : i64, scratch_operands = 0 : i64, tpu.core_type = #tpu.core_type<tc>, window_params = [{transform_indices = @transform_0, window_bounds = array<i64: 8, 8>}, {pipeline_mode = #tpu.pipeline_mode<synchronous>, transform_indices = @transform_1, window_bounds = array<i64: 8, 128>}, {pipeline_mode = #tpu.pipeline_mode<synchronous>, transform_indices = @transform_2, window_bounds = array<i64: 1, 128>}, {pipeline_mode = #tpu.pipeline_mode<synchronous>, transform_indices = @transform_3, window_bounds = array<i64: 128, 64>}, {pipeline_mode = #tpu.pipeline_mode<synchronous>, transform_indices = @transform_4, window_bounds = array<i64: 1, 64>}, {pipeline_mode = #tpu.pipeline_mode<synchronous>, transform_indices = @transform_5, window_bounds = array<i64: 64, 4>}, {pipeline_mode = #tpu.pipeline_mode<synchronous>, transform_indices = @transform_6, window_bounds = array<i64: 1, 4>}, {transform_indices = @transform_7, window_bounds = array<i64: 8, 4>}]} {
    %c0 = arith.constant 0 : index
    %c0_0 = arith.constant 0 : index
    %0 = vector.load %arg1[%c0, %c0_0] : memref<8x8xf32, #tpu.memory_space<vmem>>, vector<8x8xf32>
    %c0_1 = arith.constant 0 : index
    %c0_2 = arith.constant 0 : index
    %1 = vector.load %arg2[%c0_1, %c0_2] : memref<8x128xf32, #tpu.memory_space<vmem>>, vector<8x128xf32>
    %cst = arith.constant dense<0.000000e+00> : vector<8x128xf32>
    %2 = tpu.matmul %0, %1, %cst {dimension_numbers = #tpu.dot_dimension_numbers<[1], [0], [0], [1], [0, 0, 1, 1], [], []>} : vector<8x8xf32>, vector<8x128xf32>, vector<8x128xf32> -> vector<8x128xf32>
    %c0_3 = arith.constant 0 : index
    %c0_4 = arith.constant 0 : index
    %3 = vector.load %arg3[%c0_3, %c0_4] : memref<1x128xf32, #tpu.memory_space<vmem>>, vector<1x128xf32>
    %4 = vector.broadcast %3 : vector<1x128xf32> to vector<8x128xf32>
    %5 = arith.addf %2, %4 : vector<8x128xf32>
    %cst_5 = arith.constant 0.000000e+00 : f32
    %6 = vector.broadcast %cst_5 : f32 to vector<8x128xf32>
    %7 = arith.maximumf %5, %6 : vector<8x128xf32>
    %c0_6 = arith.constant 0 : index
    %c0_7 = arith.constant 0 : index
    %8 = vector.load %arg4[%c0_6, %c0_7] : memref<128x64xf32, #tpu.memory_space<vmem>>, vector<128x64xf32>
    %cst_8 = arith.constant dense<0.000000e+00> : vector<8x64xf32>
    %9 = tpu.matmul %7, %8, %cst_8 {dimension_numbers = #tpu.dot_dimension_numbers<[1], [0], [0], [1], [0, 0, 1, 1], [], []>} : vector<8x128xf32>, vector<128x64xf32>, vector<8x64xf32> -> vector<8x64xf32>
    %c0_9 = arith.constant 0 : index
    %c0_10 = arith.constant 0 : index
    %10 = vector.load %arg5[%c0_9, %c0_10] : memref<1x64xf32, #tpu.memory_space<vmem>>, vector<1x64xf32>
    %11 = vector.broadcast %10 : vector<1x64xf32> to vector<8x64xf32>
    %12 = arith.addf %9, %11 : vector<8x64xf32>
    %cst_11 = arith.constant 0.000000e+00 : f32
    %13 = vector.broadcast %cst_11 : f32 to vector<8x64xf32>
    %14 = arith.maximumf %12, %13 : vector<8x64xf32>
    %c0_12 = arith.constant 0 : index
    %c0_13 = arith.constant 0 : index
    %15 = vector.load %arg6[%c0_12, %c0_13] : memref<64x4xf32, #tpu.memory_space<vmem>>, vector<64x4xf32>
    %cst_14 = arith.constant dense<0.000000e+00> : vector<8x4xf32>
    %16 = tpu.matmul %14, %15, %cst_14 {dimension_numbers = #tpu.dot_dimension_numbers<[1], [0], [0], [1], [0, 0, 1, 1], [], []>} : vector<8x64xf32>, vector<64x4xf32>, vector<8x4xf32> -> vector<8x4xf32>
    %c0_15 = arith.constant 0 : index
    %c0_16 = arith.constant 0 : index
    %17 = vector.load %arg7[%c0_15, %c0_16] : memref<1x4xf32, #tpu.memory_space<vmem>>, vector<1x4xf32>
    %18 = vector.broadcast %17 : vector<1x4xf32> to vector<8x4xf32>
    %19 = arith.addf %16, %18 : vector<8x4xf32>
    %c0_17 = arith.constant 0 : index
    %c0_18 = arith.constant 0 : index
    %20 = vector.load %arg8[%c0_17, %c0_18] : memref<8x4xf32, #tpu.memory_space<vmem>>, vector<8x4xf32>
    tpu.vector_store %arg8[%c0_17, %c0_18], %19 {strides = array<i32>} : memref<8x4xf32, #tpu.memory_space<vmem>>, vector<8x4xf32>,
    return
  }
  func.func @transform_0(%arg0: i32) -> (i32, i32) {
    %c0_i32 = arith.constant 0 : i32
    %c0_i32_0 = arith.constant 0 : i32
    return %arg0, %c0_i32 : i32, i32
  }
  func.func @transform_1(%arg0: i32) -> (i32, i32) {
    %c0_i32 = arith.constant 0 : i32
    %c0_i32_0 = arith.constant 0 : i32
    %c0_i32_1 = arith.constant 0 : i32
    return %c0_i32, %c0_i32_0 : i32, i32
  }
  func.func @transform_2(%arg0: i32) -> (i32, i32) {
    %c0_i32 = arith.constant 0 : i32
    %c0_i32_0 = arith.constant 0 : i32
    %c0_i32_1 = arith.constant 0 : i32
    return %c0_i32, %c0_i32_0 : i32, i32
  }
  func.func @transform_3(%arg0: i32) -> (i32, i32) {
    %c0_i32 = arith.constant 0 : i32
    %c0_i32_0 = arith.constant 0 : i32
    %c0_i32_1 = arith.constant 0 : i32
    return %c0_i32, %c0_i32_0 : i32, i32
  }
  func.func @transform_4(%arg0: i32) -> (i32, i32) {
    %c0_i32 = arith.constant 0 : i32
    %c0_i32_0 = arith.constant 0 : i32
    %c0_i32_1 = arith.constant 0 : i32
    return %c0_i32, %c0_i32_0 : i32, i32
  }
  func.func @transform_5(%arg0: i32) -> (i32, i32) {
    %c0_i32 = arith.constant 0 : i32
    %c0_i32_0 = arith.constant 0 : i32
    %c0_i32_1 = arith.constant 0 : i32
    return %c0_i32, %c0_i32_0 : i32, i32
  }
  func.func @transform_6(%arg0: i32) -> (i32, i32) {
    %c0_i32 = arith.constant 0 : i32
    %c0_i32_0 = arith.constant 0 : i32
    %c0_i32_1 = arith.constant 0 : i32
    return %c0_i32, %c0_i32_0 : i32, i32
  }
  func.func @transform_7(%arg0: i32) -> (i32, i32) {
    %c0_i32 = arith.constant 0 : i32
    %c0_i32_0 = arith.constant 0 : i32
    return %arg0, %c0_i32 : i32, i32
  }
}

</mosaic_0001>

<bundles_post_ra>
// kernel: simple_nn_forward.1
= control target key start
LH: loop header
LB: loop body
LE: loop exit
PB: predicated region body
PF: predicated region fallthrough
CT: control target
= control target key end

     0   :  { %vm35_vm0 = vcmask 64512   ;;  %v430_v0 = vmov 0.0   ;;  %vm431_vm1 = vmmov 0   ;;  %v432_v4 = vmov 0.0|0.0   ;;  %s563_s1 = inlined_call_operand.vmem [shape: f32[8,128], index: 1, kind: input, shape index: {}]   ;;  %s564_s0 = inlined_call_operand.vmem [shape: f32[8,8], index: 0, kind: input, shape index: {}]   ;;  %s565_s3 = inlined_call_operand.vmem [shape: f32[128,64], index: 3, kind: input, shape index: {}]   ;;  %s566_s5 = inlined_call_operand.vmem [shape: f32[64,4], index: 5, kind: input, shape index: {}]   ;;  %s567_s2 = inlined_call_operand.vmem [shape: f32[1,128], index: 2, kind: input, shape index: {}]   ;;  %s568_s4 = inlined_call_operand.vmem [shape: f32[1,64], index: 4, kind: input, shape index: {}]   ;;  %s569_s6 = inlined_call_operand.vmem [shape: f32[1,4], index: 6, kind: input, shape index: {}]   ;;  %s570_s7 = inlined_call_operand.vmem [shape: f32[8,4], index: 7, kind: output, shape index: {}]  }
   0x1   :  { %332 = vmatprep.subr.mxu0 %v430_v0  ;;  %v27_v1 = vld [vmem:[%s563_s1] sm:$0xff]  ;;  %334 = vmatprep.mubr.msk.f32.mxu0 %vm431_vm1, %v430_v0  ;;  %v111_v5 = vld [vmem:[%s565_s3 + $0x8] sm:$0xff]  ;;  %v112_v6 = vld [vmem:[%s565_s3 + $0x10] sm:$0xff]  ;;  %vm219_vm2 = vcmask 523264   ;;  %vm293_vm3 = vcmask 31744  }
   0x2   :  { %v26_v2 = vld [vmem:[%s564_s0] sm:$0xff]  ;;  %333 = vmatpush3.msra.mxu0 %v27_v1  ;;  %391 = vmatprep.subr.bf16.mxu1 %v432_v4  ;;  %v113_v7 = vld [vmem:[%s565_s3 + $0x18] sm:$0xff]  ;;  %v115_v11 = vld [vmem:[%s565_s3 + $0x28] sm:$0xff] }
   0x3   :  { %v110_v3 = vld [vmem:[%s565_s3] sm:$0xff]  ;;  %335 = vmatmul.mubr.msk.f32.vlgmr.msra.gmra.mrb[0].mxu0 %vm35_vm0, %v26_v2  ;;  %369 = vmatprep.mubr.msk.f32.mxu1 %vm431_vm1, %v430_v0  ;;  %v395_v9 = vpack.c.bf16 %v113_v7, %v112_v6  ;;  %v116_v13 = vld [vmem:[%s565_s3 + $0x30] sm:$0xff]  ;;  %v117_v14 = vld [vmem:[%s565_s3 + $0x38] sm:$0xff] }
   0x4   :  { %v392_v8 = vpack.c.bf16 %v111_v5, %v110_v3  ;;  %415 = vmatprep.subr.bf16.mxu0 %v432_v4  ;;  %388 = vmatprep.mubr.msk.f32.mxu0 %vm431_vm1, %v430_v0  ;;  %v114_v10 = vld [vmem:[%s565_s3 + $0x20] sm:$0xff]  ;;  %v401_v15 = vpack.c.bf16 %v117_v14, %v116_v13  ;;  %v119_v17 = vld [vmem:[%s565_s3 + $0x48] sm:$0xff]  ;;  %v120_v19 = vld [vmem:[%s565_s3 + $0x50] sm:$0xff] }
   0x5   :  { %v398_v12 = vpack.c.bf16 %v115_v11, %v114_v10  ;;  %v118_v16 = vld [vmem:[%s565_s3 + $0x40] sm:$0xff]  ;;  %v121_v20 = vld [vmem:[%s565_s3 + $0x58] sm:$0xff]  ;;  %v123_v23 = vld [vmem:[%s565_s3 + $0x68] sm:$0xff] }
   0x6   :  { %393 = vmatpush3.bf16.msra.mxu1 %v392_v8  ;;  %v404_v18 = vpack.c.bf16 %v119_v17, %v118_v16  ;;  %v407_v21 = vpack.c.bf16 %v121_v20, %v120_v19  ;;  %v122_v22 = vld [vmem:[%s565_s3 + $0x60] sm:$0xff]  ;;  %v124_v25 = vld [vmem:[%s565_s3 + $0x70] sm:$0xff]  ;;  %v125_v26 = vld [vmem:[%s565_s3 + $0x78] sm:$0xff] }
   0x7   :  { %394 = vmatprep.subr.bf16.mxu1 %v432_v4  ;;  %v410_v24 = vpack.c.bf16 %v123_v23, %v122_v22  ;;  %v413_v27 = vpack.c.bf16 %v125_v26, %v124_v25  ;;  %v204_v28 = vld [vmem:[%s566_s5] sm:$0xff]  ;;  %v205_v29 = vld [vmem:[%s566_s5 + $0x8] sm:$0xff]  ;;  %v206_v30 = vld [vmem:[%s566_s5 + $0x10] sm:$0xff] }
   0x8   :  { %v416_v31 = vpack.c.bf16 %v205_v29, %v204_v28  ;;  %v207_v32 = vld [vmem:[%s566_s5 + $0x18] sm:$0xff]  ;;  %v208_v34 = vld [vmem:[%s566_s5 + $0x20] sm:$0xff]  ;;  %v209_v35 = vld [vmem:[%s566_s5 + $0x28] sm:$0xff] }
   0x9   :  { %v419_v33 = vpack.c.bf16 %v207_v32, %v206_v30  ;;  %v422_v36 = vpack.c.bf16 %v209_v35, %v208_v34  ;;  %v299_v37 = vld [vmem:[%s567_s2] ss:$0 sm:$0xff]  ;;  %v210_v42 = vld [vmem:[%s566_s5 + $0x30] sm:$0xff]  ;;  %v211_v43 = vld [vmem:[%s566_s5 + $0x38] sm:$0xff] }
   0xa   :  { %396 = vmatpush3.bf16.msra.mxu1 %v395_v9  ;;  %417 = vmatpush3.bf16.msra.mxu0 %v416_v31  ;;  %v425_v44 = vpack.c.bf16 %v211_v43, %v210_v42  ;;  %v301_v45 = vld [vmem:[%s568_s4] ss:$0 sm:$0xff] }
   0xb   :  { %397 = vmatprep.subr.bf16.mxu1 %v432_v4  ;;  %418 = vmatprep.subr.bf16.mxu0 %v432_v4  ;;  %v302_v50 = vld [vmem:[%s569_s6] ss:$0 sm:$0xff] }
   0xe   :  { %399 = vmatpush3.bf16.msra.mxu1 %v398_v12  ;;  %420 = vmatpush3.bf16.msra.mxu0 %v419_v33 }
   0xf   :  { %400 = vmatprep.subr.bf16.mxu1 %v432_v4  ;;  %421 = vmatprep.subr.bf16.mxu0 %v432_v4 }
  0x12   :  { %402 = vmatpush3.bf16.msra.mxu1 %v401_v15  ;;  %423 = vmatpush3.bf16.msra.mxu0 %v422_v36 }
  0x13   :  { %403 = vmatprep.subr.bf16.mxu1 %v432_v4  ;;  %424 = vmatprep.subr.bf16.mxu0 %v432_v4 }
  0x16   :  { %405 = vmatpush3.bf16.msra.mxu1 %v404_v18  ;;  %426 = vmatpush3.bf16.msra.mxu0 %v425_v44 }
  0x17   :  { %406 = vmatprep.subr.bf16.mxu1 %v432_v4 }
  0x1a   :  { %408 = vmatpush3.bf16.msra.mxu1 %v407_v21 }
  0x1b   :  { %409 = vmatprep.subr.bf16.mxu1 %v432_v4 }
  0x1e   :  { %411 = vmatpush3.bf16.msra.mxu1 %v410_v24 }
  0x1f   :  { %412 = vmatprep.subr.bf16.mxu1 %v432_v4 }
  0x22   :  { %414 = vmatpush3.bf16.msra.mxu1 %v413_v27 }
  0xd6   :  { %v105_v38 = vpop.f32.mrb[0].mxu0 }
  0xd7   :  { %v106_v39 = vadd.f32 %v299_v37, %v105_v38  ;;  %v336_v40 = vpop.f32.mrb[1].mxu0 }
  0xd9   :  { %v109_v41 = vmax.f32 %v106_v39, 0.0 }
  0xdb   :  { %370 = vmatmul.mubr.f32.vlgmr.msra.gmra.mrb[0].mxu1 %v109_v41 }
 0x1ae   :  { %v199_v46 = vpop.f32.mrb[0].mxu1 }
 0x1af   :  { %v200_v47 = vadd.f32 %v301_v45, %v199_v46  ;;  %v371_v48 = vpop.f32.mrb[1].mxu1 }
 0x1b1   :  { %v203_v49 = vmax.f32 %v200_v47, 0.0 }
 0x1b3   :  { %389 = vmatmul.mubr.msk.f32.vlgmr.msra.gmra.mrb[2].mxu0 %vm219_vm2, %v203_v49 }
 0x286   :  { %v289_v51 = vpop.f32.mrb[2].mxu0 }
 0x287   :  { %v290_v52 = vadd.f32 %v302_v50, %v289_v51  ;;  %v390_v53 = vpop.f32.mrb[3].mxu0 }
 0x289   :  { %294 = vst.msk [vmem:[%s570_s7] sm:$0xff] %vm293_vm3, %v290_v52 }

</bundles_post_ra>
